<compile_context>
chip_gen: v5e
topology: v5e:2x2
jax: 0.10.0
libtpu: 0.0.40
codegen_flags: <defaults>
</compile_context>

<pallas_src>
import functools
import math

import jax
import jax.numpy as jnp
from jax.experimental import pallas as pl
from jax.experimental.pallas import tpu as pltpu


def _round_up(a, b):
    return ((a + b - 1) // b) * b


# ----------------------------------------------------------------------------------------
# Hardware queries (cached) -- VMEM budgeting + grid sizing.
# ----------------------------------------------------------------------------------------
@functools.lru_cache(maxsize=None)
def _tpu_vmem_capacity_bytes():
    try:
        cap = int(getattr(pltpu.get_tpu_info(), "vmem_capacity_bytes", 0))
        if cap > 0:
            return cap
    except Exception:
        pass
    return 64 << 20  # conservative: v7x-sized VMEM


@functools.lru_cache(maxsize=None)
def _tpu_num_tensorcores():
    try:
        info = pltpu.get_tpu_info()
        for attr in ("num_cores", "core_count", "num_tensorcores"):
            v = getattr(info, attr, None)
            if v:
                return int(v)
        # v7x is the only generation with 64 MiB VMEM per TC, and it has 2 TCs per chip.
        if int(getattr(info, "vmem_capacity_bytes", 128 << 20)) <= (64 << 20):
            return 2
    except Exception:
        pass
    return 1


def _vmem_budget_bytes():
    """Scoped-VMEM request: physical capacity minus headroom for Mosaic internal scratch."""
    cap = _tpu_vmem_capacity_bytes()
    headroom = (12 << 20) if cap <= (64 << 20) else (16 << 20)   # ~52 MiB on v7x, ~112 on v5e/v6e
    return max(cap - headroom, 32 << 20)


@functools.lru_cache(maxsize=None)
def _single_buffer_supported():
    """Probe whether pipeline_mode=pl.Buffered(1) compiles AND behaves correctly.

    Runs eagerly so Mosaic compile-time rejections are caught here (a try/except around a
    jitted caller would not reliably see them)."""
    if not hasattr(pl, "Buffered"):
        return False
    try:
        def _k(x_ref, c_ref, o_ref):
            o_ref[...] = x_ref[...] + c_ref[...]

        out = pl.pallas_call(
            _k,
            out_shape=jax.ShapeDtypeStruct((16, 128), jnp.float32),
            grid_spec=pltpu.PrefetchScalarGridSpec(
                num_scalar_prefetch=0,
                grid=(2,),
                in_specs=[
                    pl.BlockSpec((8, 128), lambda i: (i, 0)),
                    pl.BlockSpec((8, 128), lambda i: (0, 0), pipeline_mode=pl.Buffered(1)),
                ],
                out_specs=pl.BlockSpec((8, 128), lambda i: (i, 0)),
            ),
        )(jnp.zeros((16, 128), jnp.float32), jnp.ones((8, 128), jnp.float32))
        return bool(jnp.all(jax.block_until_ready(out) == 1.0))
    except Exception:
        return False


def _resident_spec(shape, grid_rank, single_buffer):
    """BlockSpec for a parameter resident across the whole grid (constant block index)."""
    rank = len(shape)
    if grid_rank == 1:
        index_map = lambda i: (0,) * rank
    else:
        index_map = lambda i, k: (0,) * rank
    if single_buffer:
        # Constant block index -> no pipelining needed; single buffer halves weight VMEM.
        return pl.BlockSpec(shape, index_map, pipeline_mode=pl.Buffered(1))
    return pl.BlockSpec(shape, index_map)


# ----------------------------------------------------------------------------------------
# Kernel bodies
# ----------------------------------------------------------------------------------------
def _layernorm_f32(x, gamma, beta, eps=1e-5):
    x = x.astype(jnp.float32)
    mean = jnp.mean(x, axis=-1, keepdims=True)
    var = jnp.mean((x - mean) * (x - mean), axis=-1, keepdims=True)
    return (x - mean) * jax.lax.rsqrt(var + eps) * gamma.astype(jnp.float32) + beta.astype(jnp.float32)


def _gelu(h, approximate):
    if approximate:
        # tanh form: routes to the otherwise-idle EUP slot (perf path; slight numerics change)
        return jax.nn.gelu(h, approximate=True)
    # exact erf form == nn.GELU() default. Slow path: long VALU polynomial over (tm, H).
    return 0.5 * h * (1.0 + jax.lax.erf(h * (1.0 / math.sqrt(2.0))))


def ffn_kernel_resident(x_ref, g_ref, b_ref, w1_ref, b1_ref, w2_ref, b2_ref, o_ref, *,
                        approximate_gelu):
    # LayerNorm statistics in f32 (eps=1e-5, PyTorch default).
    xn = _layernorm_f32(x_ref[...], g_ref[...], b_ref[...])
    # Linear 1 (dim -> hidden): MXU in the weight dtype, f32 accumulation.
    h = jnp.dot(xn.astype(w1_ref.dtype), w1_ref[...], preferred_element_type=jnp.float32)
    h = _gelu(h + b1_ref[...].astype(jnp.float32), approximate_gelu)
    # Linear 2 (hidden -> dim).
    y = jnp.dot(h.astype(w2_ref.dtype), w2_ref[...], preferred_element_type=jnp.float32)
    o_ref[...] = (y + b2_ref[...].astype(jnp.float32)).astype(o_ref.dtype)


def ffn_kernel_htiled(x_ref, g_ref, b_ref, w1_ref, b1_ref, w2_ref, b2_ref, o_ref,
                      xn_ref, acc_ref, *, approximate_gelu):
    k = pl.program_id(1)

    @pl.when(k == 0)
    def _():
        # Compute LN once per row tile and cache it; zero the f32 accumulator.
        xn_ref[...] = _layernorm_f32(x_ref[...], g_ref[...], b_ref[...])
        acc_ref[...] = jnp.zeros_like(acc_ref)

    # Contribution of this hidden chunk: GELU is elementwise, so the H reduction decomposes.
    h = jnp.dot(xn_ref[...].astype(w1_ref.dtype), w1_ref[...], preferred_element_type=jnp.float32)
    h = _gelu(h + b1_ref[...].astype(jnp.float32), approximate_gelu)
    acc_ref[...] += jnp.dot(h.astype(w2_ref.dtype), w2_ref[...], preferred_element_type=jnp.float32)

    @pl.when(k == pl.num_programs(1) - 1)
    def _():
        o_ref[...] = (acc_ref[...] + b2_ref[...].astype(jnp.float32)).astype(o_ref.dtype)


# ----------------------------------------------------------------------------------------
# pallas_call builders
# ----------------------------------------------------------------------------------------
def _param_bytes(*arrs):
    return sum(int(a.size) * jnp.dtype(a.dtype).itemsize for a in arrs)


def _ffn_call_resident(x2, gamma, beta, w1, b1, w2, b2, *, tm, out_dtype,
                       approximate_gelu, single_buffer, vmem_limit):
    M, D = x2.shape
    H = w1.shape[1]
    res = lambda shape: _resident_spec(shape, 1, single_buffer)

    io_bytes = M * D * (jnp.dtype(x2.dtype).itemsize + jnp.dtype(out_dtype).itemsize)
    cost = pl.CostEstimate(flops=4 * M * D * H, transcendentals=M * H,
                           bytes_accessed=io_bytes + _param_bytes(gamma, beta, w1, b1, w2, b2))

    return pl.pallas_call(
        functools.partial(ffn_kernel_resident, approximate_gelu=approximate_gelu),
        out_shape=jax.ShapeDtypeStruct((M, D), out_dtype),
        grid_spec=pltpu.PrefetchScalarGridSpec(
            num_scalar_prefetch=0,
            grid=(pl.cdiv(M, tm),),
            in_specs=[
                pl.BlockSpec((tm, D), lambda i: (i, 0)),   # x rows: only streamed input
                res((1, D)),                               # LN gamma
                res((1, D)),                               # LN beta
                res((D, H)),                               # W1
                res((1, H)),                               # b1
                res((H, D)),                               # W2
                res((1, D)),                               # b2
            ],
            out_specs=pl.BlockSpec((tm, D), lambda i: (i, 0)),
        ),
        compiler_params=pltpu.CompilerParams(
            # Row tiles are independent -> megacore shards this axis across v7x's 2 TCs.
            dimension_semantics=("parallel",),
            vmem_limit_bytes=vmem_limit,
        ),
        cost_estimate=cost,
    )(x2, gamma, beta, w1, b1, w2, b2)


def _ffn_call_htiled(x2, gamma, beta, w1, b1, w2, b2, *, tm, th, out_dtype,
                     approximate_gelu, single_buffer, vmem_limit):
    M, D = x2.shape
    H = w1.shape[1]
    n_rows = pl.cdiv(M, tm)
    res = lambda shape: _resident_spec(shape, 2, single_buffer)

    io_bytes = M * D * (jnp.dtype(x2.dtype).itemsize + jnp.dtype(out_dtype).itemsize)
    # Weight chunks are re-streamed once per row tile in this path.
    cost = pl.CostEstimate(flops=4 * M * D * H, transcendentals=M * H,
                           bytes_accessed=io_bytes
                           + n_rows * _param_bytes(gamma, beta, w1, b1, w2, b2))

    return pl.pallas_call(
        functools.partial(ffn_kernel_htiled, approximate_gelu=approximate_gelu),
        out_shape=jax.ShapeDtypeStruct((M, D), out_dtype),
        grid_spec=pltpu.PrefetchScalarGridSpec(
            num_scalar_prefetch=0,
            grid=(n_rows, H // th),
            in_specs=[
                pl.BlockSpec((tm, D), lambda i, k: (i, 0)),   # x rows
                res((1, D)),                                  # LN gamma
                res((1, D)),                                  # LN beta
                pl.BlockSpec((D, th), lambda i, k: (0, k)),   # W1 chunk (streamed over H)
                pl.BlockSpec((1, th), lambda i, k: (0, k)),   # b1 chunk
                pl.BlockSpec((th, D), lambda i, k: (k, 0)),   # W2 chunk
                res((1, D)),                                  # b2
            ],
            out_specs=pl.BlockSpec((tm, D), lambda i, k: (i, 0)),
            scratch_shapes=[pltpu.VMEM((tm, D), jnp.float32),   # cached LayerNorm output
                            pltpu.VMEM((tm, D), jnp.float32)],  # f32 accumulator
        ),
        compiler_params=pltpu.CompilerParams(
            dimension_semantics=("parallel", "arbitrary"),
            vmem_limit_bytes=vmem_limit,
        ),
        cost_estimate=cost,
    )(x2, gamma, beta, w1, b1, w2, b2)


# ----------------------------------------------------------------------------------------
# Wrapper
# ----------------------------------------------------------------------------------------
def _pick_h_tile(D, H, w_itemsize, budget, tm):
    """Largest multiple-of-128 divisor of H (< H) whose double-buffered W1/W2 chunks plus
    the (tm, tH) f32 hidden intermediate fit ~40% of the VMEM budget."""
    if H % 128 != 0:
        return None
    best = None
    for t in range(128, H, 128):
        if H % t:
            continue
        need = 4 * D * t * w_itemsize + 4 * tm * t
        if need <= 0.4 * budget:
            best = t
    return best


def feed_forward(x, gamma, beta, w1, b1, w2, b2, *,
                 approximate_gelu=False, cast_matmul_to_bf16=False,
                 row_tile=None, h_tile=None):
    """x: (B, N, D). Params: gamma/beta (1, D), w1 (D, H), b1 (1, H), w2 (H, D), b2 (1, D).

    Defaults reproduce nn.Sequential(LayerNorm, Linear, GELU(), Linear) numerics (f32 matmuls,
    exact-erf GELU, f32 LN stats). Perf knobs: pass bf16 operands or cast_matmul_to_bf16=True
    for the MXU-native path (f32 accumulation kept), approximate_gelu=True for tanh GELU."""
    B, N, D = x.shape
    M = B * N
    H = w1.shape[1]
    out_dtype = x.dtype

    if cast_matmul_to_bf16 and w1.dtype == jnp.float32:
        # f32 matmuls run the MXU in a slow multi-pass mode; bf16 operands + f32 accumulation
        # is the fast path. Also halves resident weight VMEM (helps v7x's 64 MiB budget).
        w1 = w1.astype(jnp.bfloat16)
        w2 = w2.astype(jnp.bfloat16)

    budget = _vmem_budget_bytes()
    num_cores = _tpu_num_tensorcores()
    single_buffer = _single_buffer_supported()

    # ---- row tile -------------------------------------------------------------------------
    itemsize_x = jnp.dtype(x.dtype).itemsize
    align = 8 if itemsize_x >= 4 else (16 if itemsize_x == 2 else 32)   # packed sublane tile
    tm_default = 512 if _tpu_vmem_capacity_bytes() >= (100 << 20) else 256

    if row_tile is not None:
        tm = min(int(row_tile), M)
        if tm < M:
            tm = max(align, _round_up(tm, align))
    else:
        # Target >= 2 grid steps per TensorCore when there is enough work (hides x-tile DMA),
        # but never force-split tiny workloads into sub-64-row tiles.
        min_tiles = 1
        for cand in (2 * num_cores, num_cores):
            if cand > 1 and pl.cdiv(M, cand) >= 64:
                min_tiles = cand
                break
        tm_cap = _round_up(pl.cdiv(M, min_tiles), align)
        tm = M if tm_cap >= M else max(align, min(tm_default, tm_cap))

    # ---- resident vs. hidden-dim-tiled weights ----------------------------------------------
    w_itemsize = jnp.dtype(w1.dtype).itemsize
    w_bytes = (int(w1.size) + int(w2.size)) * w_itemsize
    buf_factor = 1 if single_buffer else 2

    th = None
    if h_tile is not None:
        h_tile = int(h_tile)
        if H % h_tile != 0 or (h_tile % 128 != 0 and h_tile != H):
            raise ValueError(f"h_tile={h_tile} must divide H={H} and be a multiple of 128")
        th = h_tile
    elif buf_factor * w_bytes > 0.4 * budget:
        th = _pick_h_tile(D, H, w_itemsize, budget, tm)
        # TODO(synk): if H is not a multiple of 128 and weights do not fit resident, th stays
        # None and the resident path below may exceed the VMEM budget on v7x.

    x2 = x.reshape(M, D)   # free reshape; no jnp.pad -> ragged last row tile handled in-kernel
    common = dict(tm=tm, out_dtype=out_dtype, approximate_gelu=approximate_gelu,
                  single_buffer=single_buffer, vmem_limit=budget)
    if th is not None and th < H:
        out = _ffn_call_htiled(x2, gamma, beta, w1, b1, w2, b2, th=th, **common)
    else:
        out = _ffn_call_resident(x2, gamma, beta, w1, b1, w2, b2, **common)
    return out.reshape(B, N, D)


def feed_forward_ref(x, gamma, beta, w1, b1, w2, b2):
    # pure-JAX f32 reference (matches the PyTorch module numerics)
    xf = x.astype(jnp.float32)
    mean = jnp.mean(xf, axis=-1, keepdims=True)
    var = jnp.mean((xf - mean) ** 2, axis=-1, keepdims=True)
    xn = (xf - mean) * jax.lax.rsqrt(var + 1e-5) * gamma.astype(jnp.float32) + beta.astype(jnp.float32)
    h = xn @ w1.astype(jnp.float32) + b1.astype(jnp.float32)
    h = 0.5 * h * (1.0 + jax.lax.erf(h / math.sqrt(2.0)))
    return (h @ w2.astype(jnp.float32) + b2.astype(jnp.float32)).astype(jnp.float32)


if __name__ == "__main__":
    keys = jax.random.split(jax.random.PRNGKey(0), 14)
    (kx, kg, kb, kw1, kb1, kw2, kb2, k2x, k2g, k2b, k2w1, k2b1, k2w2, k2b2) = keys

    # --- Config 1: tiny ViT-ish block, exact f32 semantics (resident-weight path) -----------
    B, N, D, Hd = 2, 8, 32, 64
    x = jax.random.normal(kx, (B, N, D), dtype=jnp.float32)
    gamma = jax.random.normal(kg, (1, D), dtype=jnp.float32) * 0.1 + 1.0
    beta = jax.random.normal(kb, (1, D), dtype=jnp.float32) * 0.1
    w1 = jax.random.normal(kw1, (D, Hd), dtype=jnp.float32) / math.sqrt(D)
    b1 = jax.random.normal(kb1, (1, Hd), dtype=jnp.float32) * 0.01
    w2 = jax.random.normal(kw2, (Hd, D), dtype=jnp.float32) / math.sqrt(Hd)
    b2 = jax.random.normal(kb2, (1, D), dtype=jnp.float32) * 0.01

    ref = feed_forward_ref(x, gamma, beta, w1, b1, w2, b2)
    out = jax.block_until_ready(feed_forward(x, gamma, beta, w1, b1, w2, b2))
    assert out.shape == (B, N, D)
    assert jnp.allclose(out, ref, atol=1e-4, rtol=1e-4)

    # --- Ragged last row tile: M=14 with an 8-row tile (garbage OOB rows must not leak) -----
    x_rag = x[:, :7, :]
    ref_rag = feed_forward_ref(x_rag, gamma, beta, w1, b1, w2, b2)
    out_rag = jax.block_until_ready(
        feed_forward(x_rag, gamma, beta, w1, b1, w2, b2, row_tile=8))
    assert out_rag.shape == (B, 7, D)
    assert jnp.allclose(out_rag, ref_rag, atol=1e-4, rtol=1e-4)

    # --- bf16 fast path: MXU-native operands, f32 accumulation + f32 LN statistics ----------
    bf = jnp.bfloat16
    out_bf = jax.block_until_ready(feed_forward(
        x.astype(bf), gamma.astype(bf), beta.astype(bf),
        w1.astype(bf), b1.astype(bf), w2.astype(bf), b2.astype(bf)))
    assert out_bf.shape == (B, N, D) and out_bf.dtype == bf
    assert jnp.allclose(out_bf.astype(jnp.float32), ref, atol=5e-2, rtol=5e-2)

    # --- f32 caller with bf16-cast weights (wrapper perf knob) -------------------------------
    out_cast = jax.block_until_ready(feed_forward(
        x, gamma, beta, w1, b1, w2, b2, cast_matmul_to_bf16=True))
    assert jnp.allclose(out_cast, ref, atol=5e-2, rtol=5e-2)

    # --- Config 2: force the hidden-dim-tiled accumulator path (D=128, H=256, tH=128) --------
    B2, N2, D2, H2 = 2, 16, 128, 256
    x2 = jax.random.normal(k2x, (B2, N2, D2), dtype=jnp.float32)
    gamma2 = jax.random.normal(k2g, (1, D2), dtype=jnp.float32) * 0.1 + 1.0
    beta2 = jax.random.normal(k2b, (1, D2), dtype=jnp.float32) * 0.1
    w1_2 = jax.random.normal(k2w1, (D2, H2), dtype=jnp.float32) / math.sqrt(D2)
    b1_2 = jax.random.normal(k2b1, (1, H2), dtype=jnp.float32) * 0.01
    w2_2 = jax.random.normal(k2w2, (H2, D2), dtype=jnp.float32) / math.sqrt(H2)
    b2_2 = jax.random.normal(k2b2, (1, D2), dtype=jnp.float32) * 0.01

    ref2 = feed_forward_ref(x2, gamma2, beta2, w1_2, b1_2, w2_2, b2_2)
    out2 = jax.block_until_ready(feed_forward(
        x2, gamma2, beta2, w1_2, b1_2, w2_2, b2_2, h_tile=128))
    assert out2.shape == (B2, N2, D2)
    assert jnp.allclose(out2, ref2, atol=1e-3, rtol=1e-3)

    print("KERNEL_OK")
</pallas_src>

<mosaic_0001>
module attributes {stable_mosaic.version = 11 : i64} {
  func.func @_k(%arg0: i32, %arg1: memref<8x128xf32, #tpu.memory_space<vmem>>, %arg2: memref<8x128xf32, #tpu.memory_space<vmem>>, %arg3: memref<8x128xf32, #tpu.memory_space<vmem>>) attributes {dimension_semantics = [#tpu.dimension_semantics<arbitrary>], iteration_bounds = array<i64: 2>, scalar_prefetch = 0 : i64, scratch_operands = 0 : i64, tpu.core_type = #tpu.core_type<tc>, window_params = [{transform_indices = @transform_0, window_bounds = array<i64: 8, 128>}, {pipeline_mode = #tpu.pipeline_mode<synchronous>, transform_indices = @transform_1, window_bounds = array<i64: 8, 128>}, {transform_indices = @transform_2, window_bounds = array<i64: 8, 128>}]} {
    %c0 = arith.constant 0 : index
    %c0_0 = arith.constant 0 : index
    %0 = vector.load %arg1[%c0, %c0_0] : memref<8x128xf32, #tpu.memory_space<vmem>>, vector<8x128xf32>
    %c0_1 = arith.constant 0 : index
    %c0_2 = arith.constant 0 : index
    %1 = vector.load %arg2[%c0_1, %c0_2] : memref<8x128xf32, #tpu.memory_space<vmem>>, vector<8x128xf32>
    %2 = arith.addf %0, %1 : vector<8x128xf32>
    %c0_3 = arith.constant 0 : index
    %c0_4 = arith.constant 0 : index
    %3 = vector.load %arg3[%c0_3, %c0_4] : memref<8x128xf32, #tpu.memory_space<vmem>>, vector<8x128xf32>
    tpu.vector_store %arg3[%c0_3, %c0_4], %2 {strides = array<i32>} : memref<8x128xf32, #tpu.memory_space<vmem>>, vector<8x128xf32>,
    return
  }
  func.func @transform_0(%arg0: i32) -> (i32, i32) {
    %c0_i32 = arith.constant 0 : i32
    %c0_i32_0 = arith.constant 0 : i32
    return %arg0, %c0_i32 : i32, i32
  }
  func.func @transform_1(%arg0: i32) -> (i32, i32) {
    %c0_i32 = arith.constant 0 : i32
    %c0_i32_0 = arith.constant 0 : i32
    %c0_i32_1 = arith.constant 0 : i32
    return %c0_i32, %c0_i32_0 : i32, i32
  }
  func.func @transform_2(%arg0: i32) -> (i32, i32) {
    %c0_i32 = arith.constant 0 : i32
    %c0_i32_0 = arith.constant 0 : i32
    return %arg0, %c0_i32 : i32, i32
  }
}

module attributes {stable_mosaic.version = 11 : i64} {
  func.func @ffn_kernel_resident(%arg0: i32, %arg1: memref<16x32xf32, #tpu.memory_space<vmem>>, %arg2: memref<1x32xf32, #tpu.memory_space<vmem>>, %arg3: memref<1x32xf32, #tpu.memory_space<vmem>>, %arg4: memref<32x64xf32, #tpu.memory_space<vmem>>, %arg5: memref<1x64xf32, #tpu.memory_space<vmem>>, %arg6: memref<64x32xf32, #tpu.memory_space<vmem>>, %arg7: memref<1x32xf32, #tpu.memory_space<vmem>>, %arg8: memref<16x32xf32, #tpu.memory_space<vmem>>) attributes {dimension_semantics = [#tpu.dimension_semantics<parallel>], iteration_bounds = array<i64: 1>, scalar_prefetch = 0 : i64, scratch_operands = 0 : i64, tpu.core_type = #tpu.core_type<tc>, window_params = [{transform_indices = @transform_0, window_bounds = array<i64: 16, 32>}, {pipeline_mode = #tpu.pipeline_mode<synchronous>, transform_indices = @transform_1, window_bounds = array<i64: 1, 32>}, {pipeline_mode = #tpu.pipeline_mode<synchronous>, transform_indices = @transform_2, window_bounds = array<i64: 1, 32>}, {pipeline_mode = #tpu.pipeline_mode<synchronous>, transform_indices = @transform_3, window_bounds = array<i64: 32, 64>}, {pipeline_mode = #tpu.pipeline_mode<synchronous>, transform_indices = @transform_4, window_bounds = array<i64: 1, 64>}, {pipeline_mode = #tpu.pipeline_mode<synchronous>, transform_indices = @transform_5, window_bounds = array<i64: 64, 32>}, {pipeline_mode = #tpu.pipeline_mode<synchronous>, transform_indices = @transform_6, window_bounds = array<i64: 1, 32>}, {transform_indices = @transform_7, window_bounds = array<i64: 16, 32>}]} {
    %c0 = arith.constant 0 : index
    %c0_0 = arith.constant 0 : index
    %0 = vector.load %arg1[%c0, %c0_0] : memref<16x32xf32, #tpu.memory_space<vmem>>, vector<16x32xf32>
    %c0_1 = arith.constant 0 : index
    %c0_2 = arith.constant 0 : index
    %1 = vector.load %arg2[%c0_1, %c0_2] : memref<1x32xf32, #tpu.memory_space<vmem>>, vector<1x32xf32>
    %c0_3 = arith.constant 0 : index
    %c0_4 = arith.constant 0 : index
    %2 = vector.load %arg3[%c0_3, %c0_4] : memref<1x32xf32, #tpu.memory_space<vmem>>, vector<1x32xf32>
    %cst = arith.constant dense<0.000000e+00> : vector<16xf32>
    %3 = vector.multi_reduction <add>, %0, %cst [1] : vector<16x32xf32> to vector<16xf32>
    %4 = vector.shape_cast %3 : vector<16xf32> to vector<16x1xf32>
    %cst_5 = arith.constant 3.200000e+01 : f32
    %5 = vector.broadcast %cst_5 : f32 to vector<16x1xf32>
    %6 = arith.divf %4, %5 : vector<16x1xf32>
    %7 = vector.broadcast %6 : vector<16x1xf32> to vector<16x32xf32>
    %8 = arith.subf %0, %7 : vector<16x32xf32>
    %9 = vector.broadcast %6 : vector<16x1xf32> to vector<16x32xf32>
    %10 = arith.subf %0, %9 : vector<16x32xf32>
    %11 = arith.mulf %8, %10 : vector<16x32xf32>
    %cst_6 = arith.constant dense<0.000000e+00> : vector<16xf32>
    %12 = vector.multi_reduction <add>, %11, %cst_6 [1] : vector<16x32xf32> to vector<16xf32>
    %13 = vector.shape_cast %12 : vector<16xf32> to vector<16x1xf32>
    %cst_7 = arith.constant 3.200000e+01 : f32
    %14 = vector.broadcast %cst_7 : f32 to vector<16x1xf32>
    %15 = arith.divf %13, %14 : vector<16x1xf32>
    %16 = vector.broadcast %6 : vector<16x1xf32> to vector<16x32xf32>
    %17 = arith.subf %0, %16 : vector<16x32xf32>
    %cst_8 = arith.constant 9.99999974E-6 : f32
    %18 = vector.broadcast %cst_8 : f32 to vector<16x1xf32>
    %19 = arith.addf %15, %18 : vector<16x1xf32>
    %20 = math.rsqrt %19 : vector<16x1xf32>
    %21 = vector.broadcast %20 : vector<16x1xf32> to vector<16x32xf32>
    %22 = arith.mulf %17, %21 : vector<16x32xf32>
    %23 = vector.broadcast %1 : vector<1x32xf32> to vector<16x32xf32>
    %24 = arith.mulf %22, %23 : vector<16x32xf32>
    %25 = vector.broadcast %2 : vector<1x32xf32> to vector<16x32xf32>
    %26 = arith.addf %24, %25 : vector<16x32xf32>
    %c0_9 = arith.constant 0 : index
    %c0_10 = arith.constant 0 : index
    %27 = vector.load %arg4[%c0_9, %c0_10] : memref<32x64xf32, #tpu.memory_space<vmem>>, vector<32x64xf32>
    %cst_11 = arith.constant dense<0.000000e+00> : vector<16x64xf32>
    %28 = tpu.matmul %26, %27, %cst_11 {dimension_numbers = #tpu.dot_dimension_numbers<[1], [0], [0], [1], [0, 0, 1, 1], [], []>} : vector<16x32xf32>, vector<32x64xf32>, vector<16x64xf32> -> vector<16x64xf32>
    %c0_12 = arith.constant 0 : index
    %c0_13 = arith.constant 0 : index
    %29 = vector.load %arg5[%c0_12, %c0_13] : memref<1x64xf32, #tpu.memory_space<vmem>>, vector<1x64xf32>
    %30 = vector.broadcast %29 : vector<1x64xf32> to vector<16x64xf32>
    %31 = arith.addf %28, %30 : vector<16x64xf32>
    %cst_14 = arith.constant 5.000000e-01 : f32
    %32 = vector.broadcast %cst_14 : f32 to vector<16x64xf32>
    %33 = arith.mulf %32, %31 : vector<16x64xf32>
    %cst_15 = arith.constant 0.707106769 : f32
    %34 = vector.broadcast %cst_15 : f32 to vector<16x64xf32>
    %35 = arith.mulf %31, %34 : vector<16x64xf32>
    %36 = math.erf %35 : vector<16x64xf32>
    %cst_16 = arith.constant 1.000000e+00 : f32
    %37 = vector.broadcast %cst_16 : f32 to vector<16x64xf32>
    %38 = arith.addf %37, %36 : vector<16x64xf32>
    %39 = arith.mulf %33, %38 : vector<16x64xf32>
    %c0_17 = arith.constant 0 : index
    %c0_18 = arith.constant 0 : index
    %40 = vector.load %arg6[%c0_17, %c0_18] : memref<64x32xf32, #tpu.memory_space<vmem>>, vector<64x32xf32>
    %cst_19 = arith.constant dense<0.000000e+00> : vector<16x32xf32>
    %41 = tpu.matmul %39, %40, %cst_19 {dimension_numbers = #tpu.dot_dimension_numbers<[1], [0], [0], [1], [0, 0, 1, 1], [], []>} : vector<16x64xf32>, vector<64x32xf32>, vector<16x32xf32> -> vector<16x32xf32>
    %c0_20 = arith.constant 0 : index
    %c0_21 = arith.constant 0 : index
    %42 = vector.load %arg7[%c0_20, %c0_21] : memref<1x32xf32, #tpu.memory_space<vmem>>, vector<1x32xf32>
    %43 = vector.broadcast %42 : vector<1x32xf32> to vector<16x32xf32>
    %44 = arith.addf %41, %43 : vector<16x32xf32>
    %c0_22 = arith.constant 0 : index
    %c0_23 = arith.constant 0 : index
    %45 = vector.load %arg8[%c0_22, %c0_23] : memref<16x32xf32, #tpu.memory_space<vmem>>, vector<16x32xf32>
    tpu.vector_store %arg8[%c0_22, %c0_23], %44 {strides = array<i32>} : memref<16x32xf32, #tpu.memory_space<vmem>>, vector<16x32xf32>,
    return
  }
  func.func @transform_0(%arg0: i32) -> (i32, i32) {
    %c0_i32 = arith.constant 0 : i32
    %c0_i32_0 = arith.constant 0 : i32
    return %arg0, %c0_i32 : i32, i32
  }
  func.func @transform_1(%arg0: i32) -> (i32, i32) {
    %c0_i32 = arith.constant 0 : i32
    %c0_i32_0 = arith.constant 0 : i32
    %c0_i32_1 = arith.constant 0 : i32
    return %c0_i32, %c0_i32_0 : i32, i32
  }
  func.func @transform_2(%arg0: i32) -> (i32, i32) {
    %c0_i32 = arith.constant 0 : i32
    %c0_i32_0 = arith.constant 0 : i32
    %c0_i32_1 = arith.constant 0 : i32
    return %c0_i32, %c0_i32_0 : i32, i32
  }
  func.func @transform_3(%arg0: i32) -> (i32, i32) {
    %c0_i32 = arith.constant 0 : i32
    %c0_i32_0 = arith.constant 0 : i32
    %c0_i32_1 = arith.constant 0 : i32
    return %c0_i32, %c0_i32_0 : i32, i32
  }
  func.func @transform_4(%arg0: i32) -> (i32, i32) {
    %c0_i32 = arith.constant 0 : i32
    %c0_i32_0 = arith.constant 0 : i32
    %c0_i32_1 = arith.constant 0 : i32
    return %c0_i32, %c0_i32_0 : i32, i32
  }
  func.func @transform_5(%arg0: i32) -> (i32, i32) {
    %c0_i32 = arith.constant 0 : i32
    %c0_i32_0 = arith.constant 0 : i32
    %c0_i32_1 = arith.constant 0 : i32
    return %c0_i32, %c0_i32_0 : i32, i32
  }
  func.func @transform_6(%arg0: i32) -> (i32, i32) {
    %c0_i32 = arith.constant 0 : i32
    %c0_i32_0 = arith.constant 0 : i32
    %c0_i32_1 = arith.constant 0 : i32
    return %c0_i32, %c0_i32_0 : i32, i32
  }
  func.func @transform_7(%arg0: i32) -> (i32, i32) {
    %c0_i32 = arith.constant 0 : i32
    %c0_i32_0 = arith.constant 0 : i32
    return %arg0, %c0_i32 : i32, i32
  }
}

</mosaic_0001>

<bundles_post_ra>
// kernel: tpu_custom_call.1
= control target key start
LH: loop header
LB: loop body
LE: loop exit
PB: predicated region body
PF: predicated region fallthrough
CT: control target
= control target key end

     0   :  { %7 = vsyncpa [#allocation3], 0  ;;  %s633_s0 = inlined_call_operand.hbm [shape: f32[16,128], index: 0, kind: input, shape index: {}]   ;;  %s634_s1 = inlined_call_operand.hbm [shape: f32[8,128], index: 1, kind: input, shape index: {}]   ;;  %s635_s2 = inlined_call_operand.hbm [shape: f32[16,128], index: 2, kind: output, shape index: {}]  }
   0x1   :  { %9 = vsyncpa [#allocation3 + $0x1], 0 }
   0x2   :  { %10 = vsyncpa [#allocation6], 0 }
   0x3   :  { %11 = vsyncpa [#allocation4], 0 }
   0x4   :  { %13 = vsyncpa [#allocation4 + $0x1], 0  ;;  %s495_s9 = smov 0   ;;  %s497_s10 = smov 0  }
   0x5   :  { %s499_s11 = smov 0   ;;  %s501_s12 = smov 0  }
   0x6 LB: > { %s516_s13 = sadd.s32 4294967295, %s477_s12   ;;  %s276_s14 = sadd.s32 4294967294, %s477_s12   ;;  %s477_s12 = sphi %s501_s12, %s645_s12   ;;  %s473_s11 = sphi %s499_s11, %s644_s11   ;;  %s469_s10 = sphi %s497_s10, %s643_s10   ;;  %s465_s9 = sphi %s495_s9, %s642_s9  }
   0x7   : > { %p39_p0 = scmp.ne.s32.totalorder %s469_s10, %s465_s9  ;;  %p40_p1 = scmp.eq.s32.totalorder %s516_s13, 0 }
   0x8   : > { %p84_p2 = scmp.eq.s32.totalorder %s516_s13, 1  ;;  %p90_p3 = scmp.eq.s32.totalorder %s276_s14, 1 }
   0x9   : > { %p525_p4 = por %p40_p1, %p39_p0  ;;  %p277_p5 = scmp.ge.s32.totalorder %s477_s12, 1 }
   0xa   : > { %p530_p6 = por %p90_p3, %p39_p0  ;;  %p97_p7 = scmp.lt.s32.totalorder %s477_s12, 3 }
   0xb   : > { %s109_s19 = sshll.u32 %s634_s1, 4  ;;  %s479_s21 = smov [#allocation5]   ;;  %s110_s19 = int_to_ptr.hbm [resolvable:$true] %s109_s19 }
   0xc   : > { %p538_p8 = pnand %p277_p5, %p97_p7  ;;  %s111_s22 = sshll.u32 %s479_s21, 4  ;;  %s112_s22 = int_to_ptr.vmem [resolvable:$true] %s111_s22 }
   0xd   : > { %s548_s23 = sadd.s32 1, %s477_s12   ;;  %s26_s24 = sadd.s32 1, %s473_s11 }
   0xe   : > { %p298_p10 = pneg %p538_p8  ;;  %s23_s25 = ssub.s32 %s477_s12, %s548_s23 }
   0xf   : > { %p24_p12 = scmp.eq.s32.totalorder %s23_s25, 0  ;;  %p33_p13 = scmp.ne.s32.totalorder %s473_s11, %s469_s10 }
  0x10   : > { %p299_p11 = pnand %p298_p10, %p40_p1  ;;  %p34_p0 = scmp.eq.s32.totalorder %s477_s12, 0 }
  0x11   : > { %s557_s26 = scalar_select %p24_p12, %s473_s11, %s26_s24  }
  0x12   : > { %301 = dma.hbm_to_vmem [thread:$0]  (!%p299_p11), %s110_s19, 128, %s112_s22, [#allocation6]  }
  0x13   : > { %p561_p3 = por %p84_p2, %p33_p13  ;;  %p311_p5 = scmp.lt.s32.totalorder %s477_s12, 2 }
  0x14   : > { %s122_s28 = sand.u32 1, %s473_s11   ;;  %s281_s29 = sshll.u32 %s477_s12, 3 }
  0x15   : > { %p35_p7 = por %p34_p0, %p33_p13  ;;  %s280_s30 = sshll.u32 %s122_s28, 3 }
  0x16   : > { %s130_s5 = scalar_lea.hbm %s633_s0, %s281_s29  ;;  %s126_s7 = scalar_lea.vmem [#allocation2], %s280_s30 }
  0x17   : > { %s132_s6 = sshll.u32 %s130_s5, 4  ;;  %s134_s8 = sshll.u32 %s126_s7, 4  ;;  %s133_s6 = int_to_ptr.hbm [resolvable:$true] %s132_s6  ;;  %s135_s8 = int_to_ptr.vmem [resolvable:$true] %s134_s8 }
  0x18   : > { %p571_p10 = pnand %p311_p5, %p35_p7  ;;  %s123_s17 = scalar_lea.sflag [#allocation3], %s122_s28 }
  0x19   : > { %s377_s18 = sshra.s32 %s133_s6, 4  ;;  %s384_s24 = scalar_lea.hbm %s633_s0, 16  ;;  %s378_s18 = int_to_ptr.hbm [resolvable:$true] %s377_s18 }
  0x1a   : > { %s379_s19 = scalar_lea.hbm %s378_s18, 8  ;;  %p381_p11 = pneg %p571_p10 }
  0x1b   : > { %p380_p2 = scmp.ne.s32.totalorder %s378_s18, %s379_s19  ;;  %p385_p0 = scmp.lt.s32.totalorder %s378_s18, %s633_s0 }
  0x1c   : > { %p386_p5 = scmp.lt.s32.totalorder %s384_s24, %s379_s19 }
  0x1d   : > { %p382_p12 = pnand %p381_p11, %p380_p2 }
  0x1e   : > { %p387_p7 = por %p386_p5, %p385_p0 }
  0x1f   : > { %p383_p13 = pneg %p382_p12 }
  0x21   : > { %p388_p9 = pnand %p387_p7, %p383_p13 }
  0x23   : > { %391 = shalt.err (!%p388_p9)
}
  0x24   : > { %305 = dma.hbm_to_vmem [thread:$0]  (!%p571_p10), %s133_s6, 128, %s135_s8, %s123_s17  }
  0x25   : > { %143 = sbr.rel (%p538_p8) target bundleno = 60 (0x3c), region = 28  ;;  %s588_s28 = sand.u32 (!%p538_p8), 1, %s469_s10  }
  0x26   : > { %s283_s30 = sshll.u32 (!%p538_p8), %s588_s28, 3  ;;  %s146_s3 = scalar_lea.sflag (!%p538_p8), [#allocation3], %s588_s28 }
  0x27   : > { %s149_s4 = scalar_lea.vmem (!%p538_p8), [#allocation2], %s283_s30 }
  0x2a   : > { %452 = dma.done.wait (%p525_p4), %s146_s3, 128  }
  0x2b   : > { %454 = vsyncadd (%p525_p4), %s146_s3, 4294967168 }
  0x2c   : > { %456 = dma.done.wait (%p40_p1), [#allocation6], 128  }
  0x2d   : > { %458 = vsyncadd (%p40_p1), [#allocation6], 4294967168  ;;  %s287_s20 = sshll.u32 %s516_s13, 3  ;;  %s175_s8 = scalar_lea.vmem [#allocation7], %s283_s30  ;;  %v176_v0 = vld [vmem:[%s149_s4] sm:$0xff]  ;;  %v177_v1 = vld [vmem:[#allocation5] sm:$0xff] }
  0x2e   : > { %s191_s7 = scalar_lea.hbm %s635_s2, %s287_s20  ;;  %s193_s14 = sshll.u32 %s175_s8, 4  ;;  %v178_v2 = vadd.f32 %v177_v1, %v176_v0  ;;  %s194_s14 = int_to_ptr.vmem [resolvable:$true] %s193_s14 }
  0x2f   : > { %s195_s17 = sshll.u32 %s191_s7, 4  ;;  %s181_s15 = scalar_lea.sflag [#allocation4], %s588_s28  ;;  %s196_s17 = int_to_ptr.hbm [resolvable:$true] %s195_s17 }
  0x30   : > { %179 = vst [vmem:[%s175_s8] sm:$0xff] %v178_v2  ;;  %s421_s18 = sshra.s32 %s196_s17, 4  ;;  %s427_s22 = scalar_lea.hbm %s635_s2, 16  ;;  %s422_s18 = int_to_ptr.hbm [resolvable:$true] %s421_s18 }
  0x31   : > { %s423_s19 = scalar_lea.hbm %s422_s18, 8  ;;  %p428_p9 = scmp.lt.s32.totalorder %s422_s18, %s635_s2 }
  0x32   : > { %p424_p1 = scmp.ne.s32.totalorder %s422_s18, %s423_s19  ;;  %p429_p10 = scmp.lt.s32.totalorder %s427_s22, %s423_s19 }
  0x34   : > { %p425_p4 = pnand %p424_p1, %p561_p3  ;;  %p430_p2 = por %p429_p10, %p428_p9 }
  0x36   : > { %p426_p8 = pneg %p425_p4 }
  0x38   : > { %p431_p11 = pnand %p430_p2, %p426_p8 }
  0x3a   : > { %434 = shalt.err (!%p431_p11)
}
  0x3b   : > { %296 = dma.vmem_to_hbm [thread:$0]  (%p561_p3), %s194_s14, 128, %s196_s17, %s181_s15  }
  0x3c PF: > { %s207_s29 = sand.u32 1, %s465_s9   ;;  %p641_p12 = scmp.ge.s32.totalorder %s477_s12, 2 }
  0x3d   : > { %s208_s28 = scalar_lea.sflag [#allocation4], %s207_s29 }
  0x3e   : > { %p307_p13 = pnand %p641_p12, %p530_p6 }
  0x40   : > { %p308_p0 = pneg %p307_p13 }
  0x42   : > { %460 = dma.done.wait (%p308_p0), %s208_s28, 128  }
  0x43   : > { %462 = vsyncadd (%p308_p0), %s208_s28, 4294967168  ;;  %p16_p5 = scmp.ge.s32.totalorder %s548_s23, 4   ;;  %s642_s9 = smov %s469_s10 }
  0x44   : > { %s643_s10 = smov %s473_s11  ;;  %s644_s11 = smov %s557_s26 }
  0x45   : > { %s645_s12 = smov %s548_s23  ;;  %18 = sbr.rel (!%p16_p5) target bundleno = 6 (0x6), region = 77 }
  0x4a   :  { %214 = vsyncpa [#allocation3], 1 }
  0x4b   :  { %216 = vsyncpa [#allocation3 + $0x1], 1 }
  0x4c   :  { %217 = vsyncpa [#allocation6], 1 }
  0x4d   :  { %218 = vsyncpa [#allocation4], 1 }
  0x4e   :  { %220 = vsyncpa [#allocation4 + $0x1], 1 }

// kernel: tpu_custom_call.1
= control target key start
LH: loop header
LB: loop body
LE: loop exit
PB: predicated region body
PF: predicated region fallthrough
CT: control target
= control target key end

     0   :  { %vm31_vm0 = vcmask 261120   ;;  %s493_s0 = inlined_call_operand.vmem [shape: f32[16,32], index: 0, kind: input, shape index: {}]   ;;  %s494_s1 = inlined_call_operand.vmem [shape: f32[1,32], index: 1, kind: input, shape index: {}]   ;;  %s495_s2 = inlined_call_operand.vmem [shape: f32[1,32], index: 2, kind: input, shape index: {}]   ;;  %s496_s3 = inlined_call_operand.vmem [shape: f32[32,64], index: 3, kind: input, shape index: {}]   ;;  %s497_s4 = inlined_call_operand.vmem [shape: f32[1,64], index: 4, kind: input, shape index: {}]   ;;  %s498_s5 = inlined_call_operand.vmem [shape: f32[64,32], index: 5, kind: input, shape index: {}]   ;;  %s499_s6 = inlined_call_operand.vmem [shape: f32[1,32], index: 6, kind: input, shape index: {}]   ;;  %s500_s7 = inlined_call_operand.hbm [shape: f32[16,32], index: 7, kind: output, shape index: {}]  }
   0x1   :  { %v28_v0 = vld [vmem:[%s493_s0 + $0x8] sm:$0xff] }
   0x2   :  { %v35_v1 = vsel %vm31_vm0, %v28_v0, 0.0 }
   0x3   :  { %36 = vadd.xlane.f32.xlu0 %v35_v1 }
   0x4   :  { %12 = vsyncpa [#allocation3], 0  ;;  %v27_v2 = vld [vmem:[%s493_s0] sm:$0xff]  ;;  %v342_v4 = vmov 32.0   ;;  %v96_v21 = vld [vmem:[%s496_s3 + $0x18] sm:$0xff]  ;;  %s343_s30 = smov [#allocation2]  }
   0x5   :  { %v32_v3 = vsel %vm31_vm0, %v27_v2, 0.0  ;;  %306 = vrcp.f32 %v342_v4  ;;  %286 = vmatpush.msra.mxu3 %v96_v21  ;;  %119 = vmatpush.msra.mxu0 %v96_v21  ;;  %v95_v22 = vld [vmem:[%s496_s3 + $0x10] sm:$0xff]  ;;  %v94_v23 = vld [vmem:[%s496_s3 + $0x8] sm:$0xff]  ;;  %v93_v24 = vld [vmem:[%s496_s3] sm:$0xff]  ;;  %s266_s8 = sshll.u32 %s343_s30, 4  ;;  %s268_s11 = sshll.u32 %s500_s7, 4  ;;  %s267_s8 = int_to_ptr.vmem [resolvable:$true] %s266_s8  ;;  %s269_s11 = int_to_ptr.hbm [resolvable:$true] %s268_s11 }
   0x6   :  { %v302_v39 = vld [vmem:[%s494_s1] ss:$0 sm:$0xff]  ;;  %v225_v63 = vld [vmem:[%s498_s5 + $0x38] sm:$0xff]  ;;  %s344_s3 = smov 128   ;;  %s345_s12 = smov 8  }
   0x7   :  { %287 = vmatpush.msra.mxu3 %v95_v22  ;;  %120 = vmatpush.msra.mxu0 %v95_v22  ;;  %v303_v43 = vld [vmem:[%s495_s2] ss:$0 sm:$0xff] }
   0x8   :  { %v304_v53 = vld [vmem:[%s497_s4] ss:$0 sm:$0xff]  ;;  %290 = vmatpush.msra.mxu2 %v225_v63  ;;  %245 = vmatpush.msra.mxu1 %v225_v63 }
   0x9   :  { %288 = vmatpush.msra.mxu3 %v94_v23  ;;  %121 = vmatpush.msra.mxu0 %v94_v23  ;;  %v219_v23 = vld [vmem:[%s498_s5 + $0x8] sm:$0xff] }
   0xb   :  { %33 = vadd.xlane.f32.xlu0 %v32_v3  ;;  %v307_v5 = vpop.eup %306  ;;  %289 = vmatpush.msra.mxu3 %v93_v24  ;;  %v224_v3 = vld [vmem:[%s498_s5 + $0x30] sm:$0xff] }
   0xc   :  { %v39_v6 = vmul.f32 32.0, %v307_v5  ;;  %vm43_vm1 = vweird.f32 %v307_v5  ;;  %122 = vmatpush.msra.mxu0 %v93_v24  ;;  %291 = vmatpush.msra.mxu2 %v224_v3 }
   0xd   :  { %246 = vmatpush.msra.mxu1 %v224_v3 }
   0xe   :  { %v40_v7 = vsub.f32 1.0, %v39_v6 }
  0x10   :  { %v41_v8 = vmul.f32 %v307_v5, %v40_v7 }
  0x12   :  { %v42_v9 = vadd.f32 %v307_v5, %v41_v8  ;;  %v223_v8 = vld [vmem:[%s498_s5 + $0x28] sm:$0xff] }
  0x13   :  { %292 = vmatpush.msra.mxu2 %v223_v8  ;;  %247 = vmatpush.msra.mxu1 %v223_v8 }
  0x14   :  { %v44_v10 = vsel %vm43_vm1, %v307_v5, %v42_v9  ;;  %vm230_vm1 = vcmask 523264  }
  0x76   :  { %v37_v11 = vpop.xlane.xlu0 %36 }
  0x77   :  { %v46_v12 = vmul.f32 %v44_v10, %v37_v11 }
  0x79   :  { %v48_v13 = vsub.f32 %v28_v0, %v46_v12 }
  0x7b   :  { %v50_v14 = vmul.f32 %v48_v13, %v48_v13 }
  0x7d   :  { %v54_v15 = vsel %vm31_vm0, %v50_v14, 0.0 }
  0x7e   :  { %55 = vadd.xlane.f32.xlu1 %v54_v15  ;;  %v34_v16 = vpop.xlane.xlu0 %33 }
  0x7f   :  { %v45_v17 = vmul.f32 %v44_v10, %v34_v16 }
  0x81   :  { %v47_v18 = vsub.f32 %v27_v2, %v45_v17 }
  0x83   :  { %v49_v19 = vmul.f32 %v47_v18, %v47_v18 }
  0x85   :  { %v51_v20 = vsel %vm31_vm0, %v49_v19, 0.0 }
  0x86   :  { %52 = vadd.xlane.f32.xlu1 %v51_v20  ;;  %v220_v20 = vld [vmem:[%s498_s5 + $0x10] sm:$0xff] }
  0xf1   :  { %v56_v25 = vpop.xlane.xlu1 %55 }
  0xf2   :  { %v58_v26 = vmul.f32 %v56_v25, %v44_v10 }
  0xf4   :  { %v60_v27 = vadd.f32 1e-05, %v58_v26 }
  0xf6   :  { %308 = vrsqrt.f32 %v60_v27  ;;  %vm77_vm3 = vweird.f32 %v60_v27 }
  0xf9   :  { %v53_v28 = vpop.xlane.xlu1 %52 }
  0xfa   :  { %v57_v29 = vmul.f32 %v53_v28, %v44_v10 }
  0xfc   :  { %v309_v30 = vpop.eup %308  ;;  %v59_v31 = vadd.f32 1e-05, %v57_v29 }
  0xfd   :  { %v72_v32 = vmul.f32 %v309_v30, %v60_v27  ;;  %vm78_vm2 = vweird.f32 %v309_v30  ;;  %v218_v27 = vld [vmem:[%s498_s5] sm:$0xff] }
  0xfe   :  { %310 = vrsqrt.f32 %v59_v31  ;;  %vm79_vm4 = vmor %vm77_vm3, %vm78_vm2  ;;  %vm67_vm6 = vweird.f32 %v59_v31 }
  0xff   :  { %v73_v33 = vmul.f32 %v309_v30, %v72_v32 }
 0x101   :  { %v74_v34 = vmul.f32 0.5, %v73_v33 }
 0x103   :  { %v75_v35 = vsub.f32 1.5, %v74_v34 }
 0x104   :  { %v311_v36 = vpop.eup %310 }
 0x105   :  { %v76_v37 = vmul.f32 %v309_v30, %v75_v35  ;;  %v62_v38 = vmul.f32 %v311_v36, %v59_v31  ;;  %vm68_vm5 = vweird.f32 %v311_v36 }
 0x106   :  { %vm69_vm7 = vmor %vm67_vm6, %vm68_vm5 }
 0x107   :  { %v80_v40 = vsel %vm79_vm4, %v309_v30, %v76_v37  ;;  %v63_v41 = vmul.f32 %v311_v36, %v62_v38 }
 0x108   :  { %v82_v42 = vmul.f32 %v80_v40, %v48_v13  ;;  %v222_v13 = vld [vmem:[%s498_s5 + $0x20] sm:$0xff] }
 0x109   :  { %v64_v44 = vmul.f32 0.5, %v63_v41  ;;  %293 = vmatpush.msra.mxu2 %v222_v13  ;;  %248 = vmatpush.msra.mxu1 %v222_v13 }
 0x10a   :  { %v87_v45 = vmul.f32 %v302_v39, %v82_v42 }
 0x10b   :  { %v65_v46 = vsub.f32 1.5, %v64_v44 }
 0x10c   :  { %v92_v47 = vadd.f32 %v303_v43, %v87_v45 }
 0x10d   :  { %v66_v48 = vmul.f32 %v311_v36, %v65_v46 }
 0x10e   :  { %281 = vmatmul.msk.f32.vlgmr.msra.gmra.mxu3 %vm31_vm0, %v92_v47 }
 0x10f   :  { %v70_v49 = vsel %vm69_vm7, %v311_v36, %v66_v48 }
 0x110   :  { %v81_v50 = vmul.f32 %v70_v49, %v47_v18  ;;  %v221_v18 = vld [vmem:[%s498_s5 + $0x18] sm:$0xff] }
 0x111   :  { %294 = vmatpush.msra.mxu2 %v221_v18  ;;  %249 = vmatpush.msra.mxu1 %v221_v18 }
 0x112   :  { %v86_v51 = vmul.f32 %v302_v39, %v81_v50 }
 0x113   :  { %295 = vmatpush.msra.mxu2 %v220_v20  ;;  %250 = vmatpush.msra.mxu1 %v220_v20 }
 0x114   :  { %v91_v52 = vadd.f32 %v303_v43, %v86_v51 }
 0x115   :  { %296 = vmatpush.msra.mxu2 %v219_v23  ;;  %251 = vmatpush.msra.mxu1 %v219_v23 }
 0x116   :  { %280 = vmatmul.msk.f32.vlgmr.msra.gmra.mxu0 %vm31_vm0, %v91_v52 }
 0x117   :  { %297 = vmatpush.msra.mxu2 %v218_v27  ;;  %252 = vmatpush.msra.mxu1 %v218_v27 }
 0x191   :  { %v127_v54 = vpop.f32.mrf.mxu3 }
 0x192   :  { %v419_v55 = vadd.f32 %v304_v53, %v127_v54 }
 0x193   :  { %v124_v56 = vpop.f32.mrf.mxu0 }
 0x194   :  { %v422_v57 = vmul.f32 0.70710677, %v419_v55  ;;  %v424_v58 = vadd.f32 %v304_v53, %v124_v56  ;;  %v131_v13 = vmul.f32 0.5, %v419_v55 }
 0x196   :  { %v174_v59 = vmul.f32 %v422_v57, %v422_v57  ;;  %v429_v60 = vmul.f32 0.70710677, %v424_v58 }
 0x198   :  { %v431_v61 = vmin.f32 %v174_v59, 16.0  ;;  %v134_v62 = vmul.f32 %v429_v60, %v429_v60 }
 0x19a   :  { %v176_v0 = vmul.f32 2.1237322e-06, %v431_v61  ;;  %v187_v1 = vmul.f32 3.8918573e-05, %v431_v61  ;;  %v440_v2 = vmin.f32 %v134_v62, 16.0 }
 0x19c   :  { %v177_v4 = vadd.f32 0.00028619796, %v176_v0  ;;  %v188_v5 = vadd.f32 0.001143296, %v187_v1  ;;  %v136_v6 = vmul.f32 2.1237322e-06, %v440_v2 }
 0x19d   :  { %v147_v7 = vmul.f32 3.8918573e-05, %v440_v2 }
 0x19e   :  { %v178_v9 = vmul.f32 %v177_v4, %v431_v61  ;;  %v189_v10 = vmul.f32 %v188_v5, %v431_v61  ;;  %v137_v11 = vadd.f32 0.00028619796, %v136_v6 }
 0x19f   :  { %v148_v12 = vadd.f32 0.001143296, %v147_v7 }
 0x1a0   :  { %v190_v14 = vadd.f32 0.014752088, %v189_v10  ;;  %v138_v15 = vmul.f32 %v137_v11, %v440_v2  ;;  %v179_v16 = vadd.f32 0.0036580483, %v178_v9 }
 0x1a1   :  { %v149_v17 = vmul.f32 %v148_v12, %v440_v2 }
 0x1a2   :  { %v191_v19 = vmul.f32 %v190_v14, %v431_v61  ;;  %v139_v21 = vadd.f32 0.0036580483, %v138_v15  ;;  %v180_v25 = vmul.f32 %v179_v16, %v431_v61  ;;  %v130_v16 = vmul.f32 0.5, %v424_v58 }
 0x1a3   :  { %v150_v22 = vadd.f32 0.014752088, %v149_v17 }
 0x1a4   :  { %v192_v24 = vadd.f32 0.112945676, %v191_v19  ;;  %v140_v29 = vmul.f32 %v139_v21, %v440_v2  ;;  %v181_v32 = vadd.f32 0.05243302, %v180_v25 }
 0x1a5   :  { %v151_v26 = vmul.f32 %v150_v22, %v440_v2 }
 0x1a6   :  { %v193_v28 = vmul.f32 %v192_v24, %v431_v61  ;;  %v141_v35 = vadd.f32 0.05243302, %v140_v29  ;;  %v182_v38 = vmul.f32 %v181_v32, %v431_v61 }
 0x1a7   :  { %v152_v30 = vadd.f32 0.112945676, %v151_v26 }
 0x1a8   :  { %v194_v31 = vadd.f32 0.4994258, %v193_v28  ;;  %v142_v40 = vmul.f32 %v141_v35, %v440_v2  ;;  %v183_v42 = vadd.f32 0.18741608, %v182_v38 }
 0x1a9   :  { %v153_v33 = vmul.f32 %v152_v30, %v440_v2 }
 0x1aa   :  { %v195_v34 = vmul.f32 %v194_v31, %v431_v61  ;;  %v143_v43 = vadd.f32 0.18741608, %v142_v40  ;;  %v184_v45 = vmul.f32 %v183_v42, %v431_v61 }
 0x1ab   :  { %v154_v36 = vadd.f32 0.4994258, %v153_v33 }
 0x1ac   :  { %v196_v37 = vadd.f32 1.0, %v195_v34  ;;  %v144_v49 = vmul.f32 %v143_v43, %v440_v2  ;;  %v185_v52 = vadd.f32 1.1283791, %v184_v45 }
 0x1ad   :  { %v155_v39 = vmul.f32 %v154_v36, %v440_v2 }
 0x1ae   :  { %312 = vrcp.f32 %v196_v37  ;;  %v208_v50 = vand.u32 2147483648, %v196_v37  ;;  %v206_v54 = vand.u32 2147483647, %v196_v37  ;;  %vm202_vm9 = vweird.f32 %v196_v37 }
 0x1af   :  { %v156_v41 = vadd.f32 1.0, %v155_v39  ;;  %v145_v62 = vadd.f32 1.1283791, %v144_v49  ;;  %v186_v3 = vmul.f32 %v185_v52, %v422_v57 }
 0x1b0   :  { %v209_v0 = vor.u32 1.1754944e-38, %v208_v50  ;;  %vm207_vm12 = vcmp.eq.f32.partialorder %v206_v54, 8.507059e+37 }
 0x1b1   :  { %314 = vrcp.f32 %v156_v41  ;;  %v168_v63 = vand.u32 2147483648, %v156_v41  ;;  %v166_v61 = vand.u32 2147483647, %v156_v41  ;;  %vm162_vm13 = vweird.f32 %v156_v41 }
 0x1b2   :  { %v146_v8 = vmul.f32 %v145_v62, %v429_v60  ;;  %v305_v60 = vld [vmem:[%s499_s6] ss:$0 sm:$0xff] }
 0x1b3   :  { %v169_v7 = vor.u32 1.1754944e-38, %v168_v63  ;;  %vm167_vm15 = vcmp.eq.f32.partialorder %v166_v61, 8.507059e+37 }
 0x1b4   :  { %v313_v44 = vpop.eup %312 }
 0x1b5   :  { %v198_v46 = vmul.f32 %v313_v44, %v196_v37  ;;  %vm203_vm8 = vweird.f32 %v313_v44 }
 0x1b6   :  { %vm204_vm10 = vmor %vm202_vm9, %vm203_vm8 }
 0x1b7   :  { %v315_v47 = vpop.eup %314  ;;  %v199_v48 = vsub.f32 1.0, %v198_v46 }
 0x1b8   :  { %v158_v51 = vmul.f32 %v315_v47, %v156_v41  ;;  %vm163_vm11 = vweird.f32 %v315_v47 }
 0x1b9   :  { %v200_v53 = vmul.f32 %v313_v44, %v199_v48  ;;  %vm164_vm14 = vmor %vm162_vm13, %vm163_vm11 }
 0x1ba   :  { %v159_v56 = vsub.f32 1.0, %v158_v51 }
 0x1bb   :  { %v201_v59 = vadd.f32 %v313_v44, %v200_v53 }
 0x1bc   :  { %v160_v1 = vmul.f32 %v315_v47, %v159_v56 }
 0x1bd   :  { %v205_v4 = vsel %vm204_vm10, %v313_v44, %v201_v59 }
 0x1be   :  { %v210_v2 = vsel %vm207_vm12, %v209_v0, %v205_v4  ;;  %v161_v5 = vadd.f32 %v315_v47, %v160_v1 }
 0x1bf   :  { %v211_v6 = vmul.f32 %v210_v2, %v186_v3 }
 0x1c0   :  { %v165_v9 = vsel %vm164_vm14, %v315_v47, %v161_v5 }
 0x1c1   :  { %v170_v10 = vsel %vm167_vm15, %v169_v7, %v165_v9  ;;  %v283_v11 = vclamps-f32 %v211_v6, 1.0 }
 0x1c2   :  { %v171_v12 = vmul.f32 %v170_v10, %v146_v8 }
 0x1c3   :  { %v215_v14 = vadd.f32 1.0, %v283_v11 }
 0x1c4   :  { %v282_v57 = vclamps-f32 %v171_v12, 1.0 }
 0x1c5   :  { %v217_v15 = vmul.f32 %v215_v14, %v131_v13 }
 0x1c6   :  { %v214_v17 = vadd.f32 1.0, %v282_v57 }
 0x1c7   :  { %285 = vmatmul.msk.f32.vlgmr.msra.gmra.mxu2 %vm230_vm1, %v217_v15 }
 0x1c8   :  { %v216_v18 = vmul.f32 %v214_v17, %v130_v16 }
 0x1ca   :  { %284 = vmatmul.msk.f32.vlgmr.msra.gmra.mxu1 %vm230_vm1, %v216_v18 }
 0x247   :  { %v254_v19 = vpop.f32.mrf.mxu1 }
 0x248   :  { %v255_v55 = vadd.f32 %v305_v60, %v254_v19 }
 0x24a   :  { %260 = vst.msk [vmem:[#allocation2] sm:$0xff] %vm31_vm0, %v255_v55  ;;  %v257_v20 = vpop.f32.mrf.mxu2 }
 0x24b   :  { %v258_v58 = vadd.f32 %v305_v60, %v257_v20 }
 0x24d   :  { %261 = vst.msk [vmem:[#allocation2 + $0x8] sm:$0xff] %vm31_vm0, %v258_v58 }
 0x24e   :  { %274 = dma.vmem_to_hbm [thread:$0]  %s267_s8, 256, %s269_s11, [#allocation3], %s344_s3, %s344_s3, %s345_s12  }
 0x24f   :  { %340 = dma.done.wait [#allocation3], 256  }
 0x250   :  { %341 = vsyncadd [#allocation3], 4294967040 }
 0x251   :  { %279 = vsyncpa [#allocation3], 1 }

</bundles_post_ra>
